<compile_context>
chip_gen: v6e
topology: v6e:2x2x1
jax: 0.10.0
libtpu: 0.0.40
codegen_flags: <defaults>
</compile_context>

<pallas_src>
import math

import jax
import jax.numpy as jnp
from jax.experimental import pallas as pl
from jax.experimental.pallas import tpu as pltpu


def make_positional_encoding(d_model: int, max_len: int = 1000) -> jnp.ndarray:
    """Deterministic construction of the `pe` buffer, matching the PyTorch __init__.

    Returns pe of shape [max_len, d_model].
    """
    position = jnp.arange(max_len, dtype=jnp.float32)[:, None]          # [max_len, 1]
    div_term = jnp.exp(
        jnp.arange(0, d_model, 2, dtype=jnp.float32)
        * (-math.log(10000.0) / d_model)
    )                                                                    # [d_model/2]
    angles = position * div_term                                         # [max_len, d_model/2]
    pe = jnp.zeros((max_len, d_model), dtype=jnp.float32)
    pe = pe.at[:, 0::2].set(jnp.sin(angles))
    pe = pe.at[:, 1::2].set(jnp.cos(angles))
    return pe


def _add_pe_kernel(x_ref, pe_ref, o_ref):
    # x_ref: (BB, TS, D) block; pe_ref: (TS, D) block (broadcast over the batch block).
    # pe already matches x.dtype; cast the sum explicitly into the output dtype.
    o_ref[...] = (x_ref[...] + pe_ref[...]).astype(o_ref.dtype)


def _choose_tiles(B: int, S: int, D: int, itemsize: int,
                  target_bytes: int = 2 * 1024 * 1024) -> tuple[int, int]:
    """Pick (batch_block, seq_tile).

    seq_tile: multiple of 8 that divides S and keeps one (TS, D) slab <= target_bytes,
    falling back to the full extent S when no such divisor exists (allowed by the
    (8, 128) rule since it then equals the full array dim).
    batch_block: largest divisor of B keeping the (BB, TS, D) x block <= target_bytes.
    """
    row_bytes = max(1, D * itemsize)
    max_rows = max(8, (target_bytes // row_bytes) // 8 * 8)

    ts = S
    if S > max_rows:
        best = None
        for cand in range(8, max_rows + 1, 8):
            if S % cand == 0:
                best = cand
        ts = best if best is not None else S

    block_budget = max(1, target_bytes // max(1, ts * row_bytes))
    bb = 1
    for cand in range(1, B + 1):
        if B % cand == 0 and cand <= block_budget:
            bb = cand
    return bb, ts


def positional_encoding_forward(x: jnp.ndarray, pe: jnp.ndarray,
                                seq_tile: int | None = None,
                                batch_block: int | None = None) -> jnp.ndarray:
    """Equivalent of PositionalEncoding.forward: x + pe[:S], broadcast over batch.

    x:  [B, S, D]
    pe: [max_len, D] (f32, built by make_positional_encoding)
    """
    B, S, D = x.shape
    if S > pe.shape[0]:
        raise ValueError(f"seq_len {S} exceeds positional-encoding max_len {pe.shape[0]}")
    if pe.shape[1] != D:
        raise ValueError(f"d_model mismatch: x has {D}, pe has {pe.shape[1]}")

    # Match dtypes in the wrapper so the kernel is a same-dtype add.
    pe_s = pe[:S].astype(x.dtype)                                        # [S, D]

    bb_auto, ts_auto = _choose_tiles(B, S, D, x.dtype.itemsize)
    ts = seq_tile if seq_tile is not None else ts_auto
    bb = batch_block if batch_block is not None else bb_auto
    if S % ts != 0:
        raise ValueError(f"seq_tile {ts} must divide seq_len {S}")
    if B % bb != 0:
        raise ValueError(f"batch_block {bb} must divide batch {B}")
    num_s_tiles = S // ts
    num_b_blocks = B // bb

    # Grid: (sequence tiles, batch blocks). Batch is innermost so the pe block index is
    # constant across the inner loop (pe DMA'd once per sequence tile).
    return pl.pallas_call(
        _add_pe_kernel,
        out_shape=jax.ShapeDtypeStruct((B, S, D), x.dtype),
        grid_spec=pltpu.PrefetchScalarGridSpec(
            num_scalar_prefetch=0,
            grid=(num_s_tiles, num_b_blocks),
            in_specs=[
                pl.BlockSpec((bb, ts, D), lambda s, b: (b, s, 0)),
                pl.BlockSpec((ts, D), lambda s, b: (s, 0)),
            ],
            out_specs=pl.BlockSpec((bb, ts, D), lambda s, b: (b, s, 0)),
        ),
        compiler_params=pltpu.CompilerParams(
            dimension_semantics=("parallel", "parallel"),
            vmem_limit_bytes=32 * 1024 * 1024,
        ),
    )(x, pe_s)


if __name__ == "__main__":
    max_len = 1000
    key = jax.random.PRNGKey(0)

    # --- Small demo shape consistent with the module (batch=2, seq=8, hidden=32). ---
    B, S, D = 2, 8, 32
    x = jax.random.normal(key, (B, S, D), dtype=jnp.float32)
    pe = make_positional_encoding(D, max_len)

    out = jax.block_until_ready(positional_encoding_forward(x, pe))
    ref = x + pe[:S][None, :, :]
    assert out.shape == (B, S, D)
    assert jnp.allclose(out, ref, atol=1e-6), "f32 mismatch vs reference"

    # --- Exercise the tiled-sequence / batch-block path and the bf16 dtype path. ---
    B2, S2, D2 = 2, 64, 128
    k1, k2 = jax.random.split(key)
    x2 = jax.random.normal(k1, (B2, S2, D2), dtype=jnp.bfloat16)
    pe2 = make_positional_encoding(D2, max_len)

    out2 = jax.block_until_ready(
        positional_encoding_forward(x2, pe2, seq_tile=16, batch_block=1))
    ref2 = (x2 + pe2[:S2].astype(jnp.bfloat16)[None, :, :]).astype(jnp.bfloat16)
    assert out2.shape == (B2, S2, D2)
    assert jnp.allclose(out2.astype(jnp.float32), ref2.astype(jnp.float32),
                        atol=1e-2), "bf16 mismatch vs reference"

    # --- Auto-tiling path (no overrides) on a larger shape. ---
    B3, S3, D3 = 4, 256, 256
    x3 = jax.random.normal(k2, (B3, S3, D3), dtype=jnp.float32)
    pe3 = make_positional_encoding(D3, max_len)
    out3 = jax.block_until_ready(positional_encoding_forward(x3, pe3))
    ref3 = x3 + pe3[:S3][None, :, :]
    assert jnp.allclose(out3, ref3, atol=1e-6), "auto-tiled mismatch vs reference"

    print("KERNEL_OK")
</pallas_src>

<mosaic_0001>
module attributes {stable_mosaic.version = 11 : i64} {
  func.func @_add_pe_kernel(%arg0: i32, %arg1: i32, %arg2: memref<2x8x32xf32, #tpu.memory_space<vmem>>, %arg3: memref<8x32xf32, #tpu.memory_space<vmem>>, %arg4: memref<2x8x32xf32, #tpu.memory_space<vmem>>) attributes {dimension_semantics = [#tpu.dimension_semantics<parallel>, #tpu.dimension_semantics<parallel>], iteration_bounds = array<i64: 1, 1>, scalar_prefetch = 0 : i64, scratch_operands = 0 : i64, tpu.core_type = #tpu.core_type<tc>, window_params = [{transform_indices = @transform_0, window_bounds = array<i64: 2, 8, 32>}, {transform_indices = @transform_1, window_bounds = array<i64: 8, 32>}, {transform_indices = @transform_2, window_bounds = array<i64: 2, 8, 32>}]} {
    %c0 = arith.constant 0 : index
    %c0_0 = arith.constant 0 : index
    %c0_1 = arith.constant 0 : index
    %0 = vector.load %arg2[%c0, %c0_0, %c0_1] : memref<2x8x32xf32, #tpu.memory_space<vmem>>, vector<2x8x32xf32>
    %c0_2 = arith.constant 0 : index
    %c0_3 = arith.constant 0 : index
    %1 = vector.load %arg3[%c0_2, %c0_3] : memref<8x32xf32, #tpu.memory_space<vmem>>, vector<8x32xf32>
    %2 = vector.shape_cast %1 : vector<8x32xf32> to vector<1x8x32xf32>
    %3 = vector.broadcast %2 : vector<1x8x32xf32> to vector<2x8x32xf32>
    %4 = arith.addf %0, %3 : vector<2x8x32xf32>
    %c0_4 = arith.constant 0 : index
    %c0_5 = arith.constant 0 : index
    %c0_6 = arith.constant 0 : index
    %5 = vector.load %arg4[%c0_4, %c0_5, %c0_6] : memref<2x8x32xf32, #tpu.memory_space<vmem>>, vector<2x8x32xf32>
    tpu.vector_store %arg4[%c0_4, %c0_5, %c0_6], %4 {strides = array<i32>} : memref<2x8x32xf32, #tpu.memory_space<vmem>>, vector<2x8x32xf32>,
    return
  }
  func.func @transform_0(%arg0: i32, %arg1: i32) -> (i32, i32, i32) {
    %c0_i32 = arith.constant 0 : i32
    %c0_i32_0 = arith.constant 0 : i32
    return %arg1, %arg0, %c0_i32 : i32, i32, i32
  }
  func.func @transform_1(%arg0: i32, %arg1: i32) -> (i32, i32) {
    %c0_i32 = arith.constant 0 : i32
    %c0_i32_0 = arith.constant 0 : i32
    return %arg0, %c0_i32 : i32, i32
  }
  func.func @transform_2(%arg0: i32, %arg1: i32) -> (i32, i32, i32) {
    %c0_i32 = arith.constant 0 : i32
    %c0_i32_0 = arith.constant 0 : i32
    return %arg1, %arg0, %c0_i32 : i32, i32, i32
  }
}

</mosaic_0001>

<bundles_post_ra>
// kernel: tpu_custom_call.1
= control target key start
LH: loop header
LB: loop body
LE: loop exit
PB: predicated region body
PF: predicated region fallthrough
CT: control target
= control target key end

     0   :  { %7 = vsyncpa [#allocation3], 0  ;;  %s170_s0 = inlined_call_operand.hbm [shape: f32[2,8,32], index: 0, kind: input, shape index: {}]   ;;  %s171_s1 = inlined_call_operand.hbm [shape: f32[8,32], index: 1, kind: input, shape index: {}]   ;;  %s172_s2 = inlined_call_operand.hbm [shape: f32[2,8,32], index: 2, kind: output, shape index: {}]  }
   0x1   :  { %8 = vsyncpa [#allocation6], 0 }
   0x2   :  { %9 = vsyncpa [#allocation4], 0  ;;  %s135_s9 = smov [#allocation2]  }
   0x3   :  { %s15_s10 = sshll.u32 %s135_s9, 4  ;;  %s16_s10 = int_to_ptr.vmem [resolvable:$true] %s15_s10 }
   0x4   :  { %s77_s11 = scalar_lea.vmem %s16_s10, 256  ;;  %p82_p1 = scmp.lt.s32.totalorder %s16_s10, %s16_s10 }
   0x5   :  { %p78_p0 = scmp.ne.s32.totalorder %s16_s10, %s77_s11  ;;  %p83_p2 = scmp.lt.s32.totalorder %s77_s11, %s77_s11 }
   0x7   :  { %p84_p3 = por %p83_p2, %p82_p1 }
   0x9   :  { %p85_p4 = pnand %p84_p3, %p78_p0 }
   0xb   :  { %88 = shalt.err (!%p85_p4)
}
   0xc   :  { %s136_s12 = smov 128   ;;  %s137_s13 = smov 8  }
   0xd   :  { %21 = dma.hbm_to_vmem [thread:$0]  %s170_s0, 256, %s16_s10, [#allocation3], %s136_s12, %s136_s12, %s137_s13  }
   0xe   :  { %s138_s16 = smov [#allocation5]  }
   0xf   :  { %s28_s17 = sshll.u32 %s138_s16, 4  ;;  %s29_s17 = int_to_ptr.vmem [resolvable:$true] %s28_s17 }
  0x10   :  { %s97_s18 = scalar_lea.vmem %s29_s17, 128  ;;  %p102_p6 = scmp.lt.s32.totalorder %s29_s17, %s29_s17 }
  0x11   :  { %p98_p5 = scmp.ne.s32.totalorder %s29_s17, %s97_s18  ;;  %p103_p7 = scmp.lt.s32.totalorder %s97_s18, %s97_s18 }
  0x13   :  { %p104_p8 = por %p103_p7, %p102_p6 }
  0x15   :  { %p105_p9 = pnand %p104_p8, %p98_p5 }
  0x17   :  { %108 = shalt.err (!%p105_p9)
}
  0x18   :  { %31 = dma.hbm_to_vmem [thread:$0]  %s171_s1, 128, %s29_s17, [#allocation6]  }
  0x19   :  { %129 = dma.done.wait [#allocation3], 256  }
  0x1a   :  { %130 = vsyncadd [#allocation3], 4294967040 }
  0x1b   :  { %131 = dma.done.wait [#allocation6], 128  }
  0x1c   :  { %132 = vsyncadd [#allocation6], 4294967168  ;;  %s139_s21 = smov [#allocation7]   ;;  %v38_v0 = vld [vmem:[#allocation2] sm:$0xff]  ;;  %v40_v1 = vld [vmem:[#allocation5] sm:$0xff]  ;;  %vm43_vm0 = vcmask 261120  }
  0x1d   :  { %s51_s0 = sshll.u32 %s139_s21, 4  ;;  %v39_v2 = vld [vmem:[#allocation2 + $0x8] sm:$0xff]  ;;  %v41_v3 = vadd.f32 %v40_v1, %v38_v0  ;;  %s52_s0 = int_to_ptr.vmem [resolvable:$true] %s51_s0 }
  0x1e   :  { %v42_v4 = vadd.f32 %v40_v1, %v39_v2  ;;  %s109_s22 = scalar_lea.vmem %s52_s0, 256  ;;  %p114_p11 = scmp.lt.s32.totalorder %s52_s0, %s52_s0 }
  0x1f   :  { %44 = vst.msk [vmem:[#allocation7] sm:$0xff] %vm43_vm0, %v41_v3  ;;  %p110_p10 = scmp.ne.s32.totalorder %s52_s0, %s109_s22  ;;  %p115_p12 = scmp.lt.s32.totalorder %s109_s22, %s109_s22 }
  0x20   :  { %45 = vst.msk [vmem:[#allocation7 + $0x8] sm:$0xff] %vm43_vm0, %v42_v4 }
  0x21   :  { %p116_p13 = por %p115_p12, %p114_p11 }
  0x23   :  { %p117_p0 = pnand %p116_p13, %p110_p10 }
  0x25   :  { %120 = shalt.err (!%p117_p0)
}
  0x26   :  { %57 = dma.vmem_to_hbm [thread:$0]  %s52_s0, 256, %s172_s2, [#allocation4], %s136_s12, %s136_s12, %s137_s13  }
  0x27   :  { %133 = dma.done.wait [#allocation4], 256  }
  0x28   :  { %134 = vsyncadd [#allocation4], 4294967040 }
  0x29   :  { %61 = vsyncpa [#allocation3], 1 }
  0x2a   :  { %62 = vsyncpa [#allocation6], 1 }
  0x2b   :  { %63 = vsyncpa [#allocation4], 1 }

</bundles_post_ra>
